<compile_context>
chip_gen: v7x
topology: tpu7x:2x2x1
jax: 0.10.0
libtpu: 0.0.40
codegen_flags: <defaults>
</compile_context>

<pallas_src>
import functools

import jax
import jax.numpy as jnp
from jax.experimental import pallas as pl
from jax.experimental.pallas import tpu as pltpu


def _vmem_limit_bytes():
    """Generation-aware scoped-VMEM limit (v5e/v6e: ~96 MiB, v7x: ~48 MiB)."""
    default = 48 * 1024 * 1024  # safe on every generation (v7x has 64 MiB)
    try:
        info = pltpu.get_tpu_info()
        cap = getattr(info, "vmem_capacity_bytes", None)
        if not cap:
            return default
        return max(default, min(int(cap) * 3 // 4, 112 * 1024 * 1024))
    except Exception:
        return default


def _pick_block_rows(N, C, vmem_budget, *dtypes):
    """Row tile: ~4 MiB per input tile (cap 1024 rows), within the VMEM budget."""
    in_itemsize = max(jnp.dtype(d).itemsize for d in dtypes)
    # Sublane packing of the *input* dtype: f32 -> 8, bf16/f16 -> 16, int8 -> 32.
    if in_itemsize == 1:
        align = 32
    elif in_itemsize == 2:
        align = 16
    else:
        align = 8

    # Per-row VMEM cost: 2 inputs x 2 pipeline buffers (native dtype) plus
    # ~4 f32 temporaries (log_q is no longer materialized).
    per_row = 2 * 2 * C * in_itemsize + 4 * C * 4
    budget = int(vmem_budget * 0.85)
    br_vmem = max(align, (budget // max(per_row, 1)) // align * align)

    # Target ~4 MiB per input tile (amortizes the ~0.35 us per-step overhead),
    # capped at 1024 rows.
    target_rows = max(align, (4 * 1024 * 1024) // max(C * in_itemsize, 1))
    target_rows = min(1024, target_rows)
    target_rows = -(-target_rows // align) * align

    n_aligned = -(-N // align) * align
    br = max(align, min(br_vmem, target_rows, n_aligned))

    # Keep >= 2 grid steps when N allows: v7x has 2 TensorCores sharing HBM BW,
    # and a 1-step grid would leave one idle on a bandwidth-bound kernel.
    if br >= N and N > align:
        half = -(-N // 2)
        br = max(align, -(-half // align) * align)
    return br


def _kd_row_kernel(student_ref, teacher_ref, out_ref, *, inv_T):
    # Whole (block_rows, C) tile in VMEM; reductions along the lane (class) axis.
    s = student_ref[...].astype(jnp.float32) * inv_T
    t = teacher_ref[...].astype(jnp.float32) * inv_T

    # Student log_softmax pieces (only per-row scalars are kept; log_q itself
    # is never materialized).
    s_max = jnp.max(s, axis=-1, keepdims=True)
    s_shift = s - s_max
    s_lse = jnp.log(jnp.sum(jnp.exp(s_shift), axis=-1, keepdims=True))

    # Teacher: unnormalized softmax pieces.
    t_max = jnp.max(t, axis=-1, keepdims=True)
    t_shift = t - t_max
    t_exp = jnp.exp(t_shift)

    # Row-wise KL with normalization hoisted and log_q eliminated:
    #   kd = (1/Z) * sum_c t_exp*(t_shift - s_shift) + s_lse - log Z,
    #   Z  = sum_c t_exp
    # == sum_c p*(log p - log q).  Underflowed t_exp contributes exactly 0, so
    # no where(p > 0, ...) guard is needed.
    num = jnp.sum(t_exp * (t_shift - s_shift), axis=-1, keepdims=True)
    z = jnp.sum(t_exp, axis=-1, keepdims=True)
    kd = num * pl.reciprocal(z, approx=False) + s_lse - jnp.log(z)
    out_ref[...] = kd  # (block_rows, 1)


def kd_rowwise_pallas(output_logits, teacher_logits, T=1.0, block_rows=None):
    """Per-row KL(softmax(teacher/T) || softmax(student/T)), shape (N,), f32."""
    N, C = output_logits.shape
    assert teacher_logits.shape == (N, C)

    vmem_limit = _vmem_limit_bytes()
    if block_rows is None:
        block_rows = _pick_block_rows(
            N, C, vmem_limit, output_logits.dtype, teacher_logits.dtype
        )

    grid = (pl.cdiv(N, block_rows),)  # ragged tail handled by Pallas (no jnp.pad)

    kd = pl.pallas_call(
        functools.partial(_kd_row_kernel, inv_T=1.0 / float(T)),
        out_shape=jax.ShapeDtypeStruct((N, 1), jnp.float32),
        grid_spec=pltpu.PrefetchScalarGridSpec(
            num_scalar_prefetch=0,
            grid=grid,
            in_specs=[
                pl.BlockSpec((block_rows, C), lambda i: (i, 0)),
                pl.BlockSpec((block_rows, C), lambda i: (i, 0)),
            ],
            out_specs=pl.BlockSpec((block_rows, 1), lambda i: (i, 0)),
        ),
        compiler_params=pltpu.CompilerParams(
            dimension_semantics=("parallel",),
            vmem_limit_bytes=vmem_limit,
        ),
    )(output_logits, teacher_logits)
    return kd.reshape(N)


def kd_loss(output_logits, teacher_logits, label_mask=None, KD_term=1.0, T=1.0):
    """Forward pass of KDLoss.forward (semantics of the PyTorch module).

    Note: like the reference, label_mask.sum() == 0 yields NaN (0/0 mean).
    """
    kd = kd_rowwise_pallas(output_logits, teacher_logits, T=T)  # (N,) f32
    if label_mask is not None:
        mask = label_mask.reshape(-1)
        kd = jnp.where(mask, kd, jnp.float32(0.0))
        kd = kd.sum() / mask.sum()
    return kd * (KD_term * T * T)


def _reference(output_logits, teacher_logits, label_mask, KD_term, T):
    log_q = jax.nn.log_softmax(output_logits.astype(jnp.float32) / T, axis=1)
    p = jax.nn.softmax(teacher_logits.astype(jnp.float32) / T, axis=1)
    kl = jnp.where(p > 0, p * (jnp.log(p) - log_q), 0.0)
    kd = jnp.sum(kl, axis=1)
    if label_mask is not None:
        mask = label_mask.reshape(-1)
        kd = jnp.where(mask, kd, 0.0)
        kd = kd.sum() / mask.sum()
    return kd * KD_term * T * T


if __name__ == "__main__":
    key = jax.random.PRNGKey(0)
    k1, k2, k3, k4, k5, k6 = jax.random.split(key, 6)

    # Case 1: small f32 logits (batch, num_classes).
    N1, C1 = 8, 32
    KD_term, T = 1.0, 2.0
    student = jax.random.normal(k1, (N1, C1), dtype=jnp.float32)
    teacher = jax.random.normal(k2, (N1, C1), dtype=jnp.float32)
    label_mask = jax.random.bernoulli(k3, 0.7, (N1,))
    label_mask = label_mask.at[0].set(True)  # avoid degenerate 0/0 mean

    out_vec = kd_loss(student, teacher, None, KD_term=KD_term, T=T)
    out_scalar = kd_loss(student, teacher, label_mask, KD_term=KD_term, T=T)
    jax.block_until_ready((out_vec, out_scalar))

    ref_vec = _reference(student, teacher, None, KD_term, T)
    ref_scalar = _reference(student, teacher, label_mask, KD_term, T)
    assert jnp.allclose(out_vec, ref_vec, atol=2e-5, rtol=2e-5)
    assert jnp.allclose(out_scalar, ref_scalar, atol=2e-5, rtol=2e-5)

    # Case 2: bf16 logits, N not a multiple of the row block (exercises the
    # pad-free ragged tail, bf16 16-row alignment, and C % 128 != 0 masking).
    N2, C2 = 20, 160
    s2 = jax.random.normal(k4, (N2, C2), dtype=jnp.float32).astype(jnp.bfloat16)
    t2 = jax.random.normal(k5, (N2, C2), dtype=jnp.float32).astype(jnp.bfloat16)
    m2 = jax.random.bernoulli(k6, 0.5, (N2,))
    m2 = m2.at[0].set(True)

    out2 = kd_loss(s2, t2, m2, KD_term=2.0, T=1.5)
    out2_vec = kd_loss(s2, t2, None, KD_term=2.0, T=1.5)
    jax.block_until_ready((out2, out2_vec))
    ref2 = _reference(s2, t2, m2, 2.0, 1.5)
    ref2_vec = _reference(s2, t2, None, 2.0, 1.5)
    assert jnp.allclose(out2, ref2, atol=1e-4, rtol=1e-4)
    assert jnp.allclose(out2_vec, ref2_vec, atol=1e-4, rtol=1e-4)

    print("KERNEL_OK")
</pallas_src>

<mosaic_0001>
module attributes {stable_mosaic.version = 11 : i64} {
  func.func @_kd_row_kernel(%arg0: i32, %arg1: memref<8x32xf32, #tpu.memory_space<vmem>>, %arg2: memref<8x32xf32, #tpu.memory_space<vmem>>, %arg3: memref<8x1xf32, #tpu.memory_space<vmem>>) attributes {dimension_semantics = [#tpu.dimension_semantics<parallel>], iteration_bounds = array<i64: 1>, scalar_prefetch = 0 : i64, scratch_operands = 0 : i64, tpu.core_type = #tpu.core_type<tc>, window_params = [{transform_indices = @transform_0, window_bounds = array<i64: 8, 32>}, {transform_indices = @transform_1, window_bounds = array<i64: 8, 32>}, {transform_indices = @transform_2, window_bounds = array<i64: 8, 1>}]} {
    %c0 = arith.constant 0 : index
    %c0_0 = arith.constant 0 : index
    %0 = vector.load %arg1[%c0, %c0_0] : memref<8x32xf32, #tpu.memory_space<vmem>>, vector<8x32xf32>
    %cst = arith.constant 5.000000e-01 : f32
    %1 = vector.broadcast %cst : f32 to vector<8x32xf32>
    %2 = arith.mulf %0, %1 : vector<8x32xf32>
    %c0_1 = arith.constant 0 : index
    %c0_2 = arith.constant 0 : index
    %3 = vector.load %arg2[%c0_1, %c0_2] : memref<8x32xf32, #tpu.memory_space<vmem>>, vector<8x32xf32>
    %cst_3 = arith.constant 5.000000e-01 : f32
    %4 = vector.broadcast %cst_3 : f32 to vector<8x32xf32>
    %5 = arith.mulf %3, %4 : vector<8x32xf32>
    %cst_4 = arith.constant dense<0xFF800000> : vector<8xf32>
    %6 = vector.multi_reduction <maximumf>, %2, %cst_4 [1] : vector<8x32xf32> to vector<8xf32>
    %7 = vector.shape_cast %6 : vector<8xf32> to vector<8x1xf32>
    %8 = vector.broadcast %7 : vector<8x1xf32> to vector<8x32xf32>
    %9 = arith.subf %2, %8 : vector<8x32xf32>
    %10 = math.exp %9 : vector<8x32xf32>
    %cst_5 = arith.constant dense<0.000000e+00> : vector<8xf32>
    %11 = vector.multi_reduction <add>, %10, %cst_5 [1] : vector<8x32xf32> to vector<8xf32>
    %12 = vector.shape_cast %11 : vector<8xf32> to vector<8x1xf32>
    %13 = math.log %12 : vector<8x1xf32>
    %cst_6 = arith.constant dense<0xFF800000> : vector<8xf32>
    %14 = vector.multi_reduction <maximumf>, %5, %cst_6 [1] : vector<8x32xf32> to vector<8xf32>
    %15 = vector.shape_cast %14 : vector<8xf32> to vector<8x1xf32>
    %16 = vector.broadcast %15 : vector<8x1xf32> to vector<8x32xf32>
    %17 = arith.subf %5, %16 : vector<8x32xf32>
    %18 = math.exp %17 : vector<8x32xf32>
    %19 = arith.subf %17, %9 : vector<8x32xf32>
    %20 = arith.mulf %18, %19 : vector<8x32xf32>
    %cst_7 = arith.constant dense<0.000000e+00> : vector<8xf32>
    %21 = vector.multi_reduction <add>, %20, %cst_7 [1] : vector<8x32xf32> to vector<8xf32>
    %22 = vector.shape_cast %21 : vector<8xf32> to vector<8x1xf32>
    %cst_8 = arith.constant dense<0.000000e+00> : vector<8xf32>
    %23 = vector.multi_reduction <add>, %18, %cst_8 [1] : vector<8x32xf32> to vector<8xf32>
    %24 = vector.shape_cast %23 : vector<8xf32> to vector<8x1xf32>
    %25 = tpu.reciprocal %24 : vector<8x1xf32> -> vector<8x1xf32>
    %26 = arith.mulf %22, %25 : vector<8x1xf32>
    %27 = arith.addf %26, %13 : vector<8x1xf32>
    %28 = math.log %24 : vector<8x1xf32>
    %29 = arith.subf %27, %28 : vector<8x1xf32>
    %c0_9 = arith.constant 0 : index
    %c0_10 = arith.constant 0 : index
    %30 = vector.load %arg3[%c0_9, %c0_10] : memref<8x1xf32, #tpu.memory_space<vmem>>, vector<8x1xf32>
    tpu.vector_store %arg3[%c0_9, %c0_10], %29 {strides = array<i32>} : memref<8x1xf32, #tpu.memory_space<vmem>>, vector<8x1xf32>,
    return
  }
  func.func @transform_0(%arg0: i32) -> (i32, i32) {
    %c0_i32 = arith.constant 0 : i32
    %c0_i32_0 = arith.constant 0 : i32
    return %arg0, %c0_i32 : i32, i32
  }
  func.func @transform_1(%arg0: i32) -> (i32, i32) {
    %c0_i32 = arith.constant 0 : i32
    %c0_i32_0 = arith.constant 0 : i32
    return %arg0, %c0_i32 : i32, i32
  }
  func.func @transform_2(%arg0: i32) -> (i32, i32) {
    %c0_i32 = arith.constant 0 : i32
    %c0_i32_0 = arith.constant 0 : i32
    return %arg0, %c0_i32 : i32, i32
  }
}

</mosaic_0001>

<bundles_post_ra>
// kernel: tpu_custom_call.1
= control target key start
LH: loop header
LB: loop body
LE: loop exit
PB: predicated region body
PF: predicated region fallthrough
CT: control target
= control target key end

     0   :  { %7 = vsyncpa [#allocation3], 0  ;;  %s188_s0 = inlined_call_operand.hbm [shape: f32[8,32], index: 0, kind: input, shape index: {}]   ;;  %s189_s1 = inlined_call_operand.hbm [shape: f32[8,32], index: 1, kind: input, shape index: {}]   ;;  %s190_s2 = inlined_call_operand.vmem [shape: f32[8,1], index: 2, kind: output, shape index: {}]  }
   0x1   :  { %8 = vsyncpa [#allocation5], 0  ;;  %s139_s9 = smov [#allocation2]   ;;  %s140_s11 = smov [#allocation4]  }
   0x2   :  { %s15_s10 = sshll.u32 %s139_s9, 4  ;;  %s25_s12 = sshll.u32 %s140_s11, 4  ;;  %s16_s10 = int_to_ptr.vmem [resolvable:$true] %s15_s10  ;;  %s26_s12 = int_to_ptr.vmem [resolvable:$true] %s25_s12 }
   0x3   :  { %s91_s15 = scalar_lea.hbm %s188_s0, 128 }
   0x4   :  { %p92_p0 = scmp.ne.s32.totalorder %s188_s0, %s91_s15  ;;  %p95_p1 = scmp.lt.u32.totalorder %s91_s15, %s188_s0 }
   0x6   :  { %p97_p2 = pnand %p95_p1, %p92_p0 }
   0x8   :  { %100 = shalt.err (!%p97_p2)
}
   0x9   :  { %s101_s20 = scalar_lea.vmem %s16_s10, 128  ;;  %p106_p4 = scmp.lt.s32.totalorder %s16_s10, %s16_s10 }
   0xa   :  { %p102_p3 = scmp.ne.s32.totalorder %s16_s10, %s101_s20  ;;  %p107_p5 = scmp.lt.s32.totalorder %s101_s20, %s101_s20 }
   0xc   :  { %p108_p6 = por %p107_p5, %p106_p4 }
   0xe   :  { %p109_p7 = pnand %p108_p6, %p102_p3 }
  0x10   :  { %112 = shalt.err (!%p109_p7)
}
  0x11   :  { %18 = dma.hbm_to_vmem [thread:$0]  %s188_s0, 128, %s16_s10, [#allocation3]  }
  0x12   :  { %s113_s25 = scalar_lea.hbm %s189_s1, 128 }
  0x13   :  { %p114_p8 = scmp.ne.s32.totalorder %s189_s1, %s113_s25  ;;  %p117_p9 = scmp.lt.u32.totalorder %s113_s25, %s189_s1 }
  0x15   :  { %p119_p10 = pnand %p117_p9, %p114_p8 }
  0x17   :  { %122 = shalt.err (!%p119_p10)
}
  0x18   :  { %s123_s30 = scalar_lea.vmem %s26_s12, 128  ;;  %p128_p12 = scmp.lt.s32.totalorder %s26_s12, %s26_s12 }
  0x19   :  { %p124_p11 = scmp.ne.s32.totalorder %s26_s12, %s123_s30  ;;  %p129_p13 = scmp.lt.s32.totalorder %s123_s30, %s123_s30 }
  0x1b   :  { %p130_p0 = por %p129_p13, %p128_p12 }
  0x1d   :  { %p131_p1 = pnand %p130_p0, %p124_p11 }
  0x1f   :  { %134 = shalt.err (!%p131_p1)
}
  0x20   :  { %28 = dma.hbm_to_vmem [thread:$0]  %s189_s1, 128, %s26_s12, [#allocation5]  }
  0x21   :  { %135 = dma.done.wait [#allocation3], 128  }
  0x22   :  { %136 = vsyncadd [#allocation3], 4294967168 }
  0x23   :  { %137 = dma.done.wait [#allocation5], 128  }
  0x24   :  { %138 = vsyncadd [#allocation5], 4294967168  ;;  %v35_v0 = vld [vmem:[#allocation2] sm:$0xff]  ;;  %vm39_vm0 = vcmask 261120   ;;  %v37_v1 = vld [vmem:[#allocation4] sm:$0xff]  ;;  %vm71_vm1 = vcmask 7168  }
  0x25   :  { %v36_v2 = vmul.f32 0.5, %v35_v0  ;;  %v38_v3 = vmul.f32 0.5, %v37_v1 }
  0x27   :  { %v40_v4 = vsel %vm39_vm0, %v36_v2, -inf  ;;  %v51_v5 = vsel %vm39_vm0, %v38_v3, -inf }
  0x28   :  { %41 = vmax.xlane.f32.xlu0 %v40_v4 }
  0x2c   :  { %52 = vmax.xlane.f32.xlu0 %v51_v5 }
  0xb5   :  { %v42_v6 = vpop.xlane.xlu0 %41 }
  0xb6   :  { %v43_v7 = vsub.f32 %v36_v2, %v42_v6 }
  0xb8   :  { %v44_v8 = vmul.f32 1.442695, %v43_v7 }
  0xb9   :  { %v53_v9 = vpop.xlane.xlu0 %52 }
  0xba   :  { %81 = vpow2.f32 %v44_v8  ;;  %v54_v10 = vsub.f32 %v38_v3, %v53_v9 }
  0xbc   :  { %v55_v11 = vmul.f32 1.442695, %v54_v10  ;;  %v57_v14 = vsub.f32 %v54_v10, %v43_v7 }
  0xbe   :  { %83 = vpow2.f32 %v55_v11 }
  0xc4   :  { %v82_v12 = vpop.eup %81 }
  0xc5   :  { %v46_v13 = vsel %vm39_vm0, %v82_v12, 0.0 }
  0xc6   :  { %47 = vadd.xlane.f32.xlu1 %v46_v13 }
  0xc8   :  { %v84_v15 = vpop.eup %83 }
  0xc9   :  { %v62_v16 = vsel %vm39_vm0, %v84_v15, 0.0  ;;  %v58_v17 = vmul.f32 %v84_v15, %v57_v14 }
  0xca   :  { %63 = vadd.xlane.f32.xlu1 %v62_v16 }
  0xcb   :  { %v59_v18 = vsel %vm39_vm0, %v58_v17, 0.0 }
  0xcc   :  { %60 = vadd.xlane.f32.xlu0 %v59_v18 }
 0x153   :  { %v48_v19 = vpop.xlane.xlu1 %47 }
 0x154   :  { %85 = vlog2.f32 %v48_v19 }
 0x157   :  { %v64_v20 = vpop.xlane.xlu1 %63 }
 0x158   :  { %87 = vrcp.f32 %v64_v20 }
 0x159   :  { %89 = vlog2.f32 %v64_v20  ;;  %v61_v23 = vpop.xlane.xlu0 %60 }
 0x15e   :  { %v86_v21 = vpop.eup %85 }
 0x15f   :  { %v50_v25 = vmul.f32 0.6931472, %v86_v21 }
 0x162   :  { %v88_v22 = vpop.eup %87 }
 0x163   :  { %v90_v24 = vpop.eup %89  ;;  %v66_v26 = vmul.f32 %v88_v22, %v61_v23 }
 0x164   :  { %v69_v27 = vmul.f32 0.6931472, %v90_v24 }
 0x165   :  { %v67_v28 = vadd.f32 %v66_v26, %v50_v25 }
 0x167   :  { %v70_v29 = vsub.f32 %v67_v28, %v69_v27 }
 0x169   :  { %72 = vst.msk [vmem:[%s190_s2] sm:$0xff] %vm71_vm1, %v70_v29 }
 0x16a   :  { %77 = vsyncpa [#allocation3], 1 }
 0x16b   :  { %78 = vsyncpa [#allocation5], 1 }

</bundles_post_ra>
